<compile_context>
chip_gen: v6e
topology: v6e:2x2x1
jax: 0.10.0
libtpu: 0.0.40
codegen_flags: <defaults>
</compile_context>

<pallas_src>
import functools

import jax
import jax.numpy as jnp
from jax.experimental import pallas as pl
from jax.experimental.pallas import tpu as pltpu


def _round_up(x, m):
    return ((x + m - 1) // m) * m


def _choose_tiling(P, HW):
    """Pick (tile_p, grid_p, hw_tile, grid_hw) for the (P, HW) flattened view."""
    if P <= 32:
        tile_p = P                       # full plane axis is always a legal block
    else:
        # >= 2 plane blocks when possible (keeps both v7x TensorCores busy),
        # multiple of 32 (uint8 packs 32 rows per vreg), capped at 256
        # (~22.5 MiB double-buffered u8-in + f32-out fits every generation).
        tile_p = min(256, max(32, _round_up(pl.cdiv(P, 2), 32)))
    grid_p = pl.cdiv(P, tile_p)
    # If the plane axis collapsed to one block, split HW in two so the grid
    # still has >= 2 parallel steps (v7x megacore). Halves stay lane-aligned.
    if grid_p == 1 and HW % 256 == 0:
        hw_tile = HW // 2
    else:
        hw_tile = HW
    grid_hw = HW // hw_tile
    return tile_p, grid_p, hw_tile, grid_hw


def _make_kernel(tile_p, sliced_params, out_dtype):
    def kernel(x_ref, scale_ref, bias_ref, o_ref):
        # scale/bias are resident full-array VMEM blocks; pick this step's rows.
        if sliced_params:
            start = pl.multiple_of(pl.program_id(0) * tile_p, tile_p)
            s = scale_ref[pl.ds(start, tile_p), :]
            b = bias_ref[pl.ds(start, tile_p), :]
        else:
            s = scale_ref[...]
            b = bias_ref[...]
        x_f = x_ref[...].astype(jnp.float32)
        # (x/255 - mean)/std  ==  x * scale + bias  (constants folded in wrapper)
        o_ref[...] = (x_f * s + b).astype(out_dtype)
    return kernel


@functools.partial(jax.jit, static_argnames=("out_dtype",))
def camelyon17_transform(x_u8, scale_per_plane, bias_per_plane,
                         out_dtype=jnp.float32):
    """x_u8: (N, C, H, W) uint8. scale/bias_per_plane: (N*C,) float32."""
    N, C, H, W = x_u8.shape
    P = N * C
    HW = H * W

    x_flat = x_u8.reshape(P, HW)          # lane-dense: 9216 = 72 * 128 for 96x96
    tile_p, grid_p, hw_tile, grid_hw = _choose_tiling(P, HW)

    sliced_params = grid_p > 1
    P_pad = grid_p * tile_p               # keep in-kernel pl.ds slices in bounds
    scale2d = scale_per_plane.reshape(P, 1).astype(jnp.float32)
    bias2d = bias_per_plane.reshape(P, 1).astype(jnp.float32)
    if P_pad != P:
        scale2d = jnp.pad(scale2d, ((0, P_pad - P), (0, 0)))
        bias2d = jnp.pad(bias2d, ((0, P_pad - P), (0, 0)))

    out_bytes = jnp.dtype(out_dtype).itemsize
    cost = pl.CostEstimate(
        flops=2 * P * HW,                 # one FMA per element
        transcendentals=0,
        bytes_accessed=P * HW * (1 + out_bytes) + 2 * P_pad * 4,
    )

    kernel = _make_kernel(tile_p, sliced_params, out_dtype)

    out = pl.pallas_call(
        kernel,
        out_shape=jax.ShapeDtypeStruct((P, HW), out_dtype),
        grid=(grid_p, grid_hw),
        in_specs=[
            pl.BlockSpec((tile_p, hw_tile), lambda i, j: (i, j)),
            # Constant index map -> DMA'd once, stays resident in VMEM.
            pl.BlockSpec((P_pad, 1), lambda i, j: (0, 0)),
            pl.BlockSpec((P_pad, 1), lambda i, j: (0, 0)),
        ],
        out_specs=pl.BlockSpec((tile_p, hw_tile), lambda i, j: (i, j)),
        compiler_params=pltpu.CompilerParams(
            dimension_semantics=("parallel", "parallel"),
            vmem_limit_bytes=32 << 20,    # covers v5e's 16 MiB scoped default
        ),
        cost_estimate=cost,
    )(x_flat, scale2d, bias2d)

    return out.reshape(N, C, H, W)


def build_params(batch, mean=(0.72, 0.56, 0.715), std=(0.19, 0.224, 0.17)):
    """Fold ConvertImageDtype's 1/255 and Normalize's mean/std into scale/bias."""
    mean = jnp.asarray(mean, dtype=jnp.float32)
    std = jnp.asarray(std, dtype=jnp.float32)
    scale = 1.0 / (255.0 * std)           # per-channel multiplier
    bias = -mean / std                    # per-channel additive offset
    return jnp.tile(scale, batch), jnp.tile(bias, batch)   # (N*C,), (N*C,)


# TODO(synk): the augmentation=True branch (RandomHorizontalFlip, RandAugment,
# CutoutOnFloat) is a randomized training-time path and is not implemented;
# the default forward (augmentation=False) is fully reproduced.


if __name__ == "__main__":
    key = jax.random.PRNGKey(0)
    # Shapes consistent with the module: 3-channel 96x96 patches, batch=2.
    N, C, H, W = 2, 3, 96, 96
    x = jax.random.randint(key, (N, C, H, W), 0, 256, dtype=jnp.int32).astype(jnp.uint8)

    scale_pp, bias_pp = build_params(N)
    y = camelyon17_transform(x, scale_pp, bias_pp)
    y = jax.block_until_ready(y)

    # Reference check in plain JAX (same math as ConvertImageDtype + Normalize).
    mean = jnp.asarray((0.72, 0.56, 0.715), jnp.float32).reshape(1, C, 1, 1)
    std = jnp.asarray((0.19, 0.224, 0.17), jnp.float32).reshape(1, C, 1, 1)
    ref = (x.astype(jnp.float32) / 255.0 - mean) / std
    assert y.shape == (N, C, H, W) and y.dtype == jnp.float32
    assert jnp.allclose(y, ref, atol=1e-5, rtol=1e-5)

    # Optional low-writeback variant (bf16 output) for consumers that allow it.
    y_bf16 = jax.block_until_ready(
        camelyon17_transform(x, scale_pp, bias_pp, out_dtype=jnp.bfloat16))
    assert y_bf16.dtype == jnp.bfloat16
    assert jnp.allclose(y_bf16.astype(jnp.float32), ref, atol=3e-2, rtol=3e-2)

    print("KERNEL_OK")
</pallas_src>

<mosaic_0001>
module attributes {stable_mosaic.version = 11 : i64} {
  func.func @kernel(%arg0: i32, %arg1: i32, %arg2: memref<6x4608xi8, #tpu.memory_space<vmem>>, %arg3: memref<6x1xf32, #tpu.memory_space<vmem>>, %arg4: memref<6x1xf32, #tpu.memory_space<vmem>>, %arg5: memref<6x4608xf32, #tpu.memory_space<vmem>>) attributes {dimension_semantics = [#tpu.dimension_semantics<parallel>, #tpu.dimension_semantics<parallel>], iteration_bounds = array<i64: 1, 2>, scalar_prefetch = 0 : i64, scratch_operands = 0 : i64, tpu.core_type = #tpu.core_type<tc>, window_params = [{transform_indices = @transform_0, window_bounds = array<i64: 6, 4608>}, {pipeline_mode = #tpu.pipeline_mode<synchronous>, transform_indices = @transform_1, window_bounds = array<i64: 6, 1>}, {pipeline_mode = #tpu.pipeline_mode<synchronous>, transform_indices = @transform_2, window_bounds = array<i64: 6, 1>}, {transform_indices = @transform_3, window_bounds = array<i64: 6, 4608>}]} {
    %c0 = arith.constant 0 : index
    %c0_0 = arith.constant 0 : index
    %0 = vector.load %arg3[%c0, %c0_0] : memref<6x1xf32, #tpu.memory_space<vmem>>, vector<6x1xf32>
    %c0_1 = arith.constant 0 : index
    %c0_2 = arith.constant 0 : index
    %1 = vector.load %arg4[%c0_1, %c0_2] : memref<6x1xf32, #tpu.memory_space<vmem>>, vector<6x1xf32>
    %c0_3 = arith.constant 0 : index
    %c0_4 = arith.constant 0 : index
    %2 = vector.load %arg2[%c0_3, %c0_4] : memref<6x4608xi8, #tpu.memory_space<vmem>>, vector<6x4608xi8>
    %3 = arith.uitofp %2 : vector<6x4608xi8> to vector<6x4608xf32>
    %4 = vector.broadcast %0 : vector<6x1xf32> to vector<6x4608xf32>
    %5 = arith.mulf %3, %4 : vector<6x4608xf32>
    %6 = vector.broadcast %1 : vector<6x1xf32> to vector<6x4608xf32>
    %7 = arith.addf %5, %6 : vector<6x4608xf32>
    %c0_5 = arith.constant 0 : index
    %c0_6 = arith.constant 0 : index
    %8 = vector.load %arg5[%c0_5, %c0_6] : memref<6x4608xf32, #tpu.memory_space<vmem>>, vector<6x4608xf32>
    tpu.vector_store %arg5[%c0_5, %c0_6], %7 {strides = array<i32>} : memref<6x4608xf32, #tpu.memory_space<vmem>>, vector<6x4608xf32>,
    return
  }
  func.func @transform_0(%arg0: i32, %arg1: i32) -> (i32, i32) {
    %c0_i32 = arith.constant 0 : i32
    return %arg0, %arg1 : i32, i32
  }
  func.func @transform_1(%arg0: i32, %arg1: i32) -> (i32, i32) {
    %c0_i32 = arith.constant 0 : i32
    %c0_i32_0 = arith.constant 0 : i32
    %c0_i32_1 = arith.constant 0 : i32
    return %c0_i32, %c0_i32_0 : i32, i32
  }
  func.func @transform_2(%arg0: i32, %arg1: i32) -> (i32, i32) {
    %c0_i32 = arith.constant 0 : i32
    %c0_i32_0 = arith.constant 0 : i32
    %c0_i32_1 = arith.constant 0 : i32
    return %c0_i32, %c0_i32_0 : i32, i32
  }
  func.func @transform_3(%arg0: i32, %arg1: i32) -> (i32, i32) {
    %c0_i32 = arith.constant 0 : i32
    return %arg0, %arg1 : i32, i32
  }
}

</mosaic_0001>

<bundles_post_ra>
// kernel: camelyon17_transform.1
= control target key start
LH: loop header
LB: loop body
LE: loop exit
PB: predicated region body
PF: predicated region fallthrough
CT: control target
= control target key end

     0   :  { %s614_s12 = smov 0   ;;  %s616_s13 = smov 0   ;;  %s841_s0 = inlined_call_operand.vmem [shape: u8[6,9216], index: 0, kind: input, shape index: {}]   ;;  %s842_s1 = inlined_call_operand.vmem [shape: f32[6,1], index: 1, kind: input, shape index: {}]   ;;  %s843_s2 = inlined_call_operand.vmem [shape: f32[6,1], index: 2, kind: input, shape index: {}]   ;;  %s844_s3 = inlined_call_operand.vmem [shape: f32[6,9216], index: 3, kind: output, shape index: {}]  }
   0x1   :  { %s618_s14 = smov 0  }
   0x2 LB: > { %s22_s15 = sadd.s32 1, %s587_s13  ;;  %p538_p0 = scmp.ge.s32.totalorder %s591_s14, 1  ;;  %s591_s14 = sphi %s618_s14, %s13_s14   ;;  %s587_s13 = sphi %s616_s13, %s846_s13   ;;  %s583_s12 = sphi %s614_s12, %s845_s12  }
   0x3   : > { %p23_p1 = scmp.ge.s32.totalorder %s22_s15, 2  ;;  %p158_p2 = scmp.lt.s32.totalorder %s591_s14, 3 }
   0x5   : > { %s848_s15 = smov (%p23_p1, %s22_s15), 0  ;;  %p159_p3 = pnand %p538_p0, %p158_p2 }
   0x6   : > { %s190_s20 = smul.u32 (!%p159_p3), 36, %s583_s12 }
   0x7   : > { %162 = sbr.rel (%p159_p3) target bundleno = 168 (0xa8), region = 32 }
   0x8   : > { %p193_p4 = scmp.lt.s32.totalorder (!%p159_p3), %s190_s20, 71 }
   0xc   : > { %v210_v0 = vld [vmem:[%s842_s1] sm:$0x3f]  ;;  %v593_v1 = vmov 0   ;;  %s850_s20 = smov (!%p193_p4, %s190_s20), 71 }
   0xd   : > { %568 = vset.pattern.permute.xlu0 %v593_v1  ;;  %v211_v2 = vld [vmem:[%s843_s2] sm:$0x3f]  ;;  %s539_s21 = sshll.u32 %s850_s20, 1  ;;  %s540_s25 = sshll.u32 %s850_s20, 3 }
   0xe   : > { %331 = vperm.xlu0 %568, %v210_v0   ;;  %s198_s24 = scalar_lea.vmem %s841_s0, %s539_s21  ;;  %s758_s28 = scalar_lea.vmem %s844_s3, %s540_s25 }
   0xf   : > { %v212_v3 = vld [vmem:[%s198_s24] sm:$0xff]  ;;  %v213_v4 = vld [vmem:[%s198_s24 + $0x8] sm:$0xff]  ;;  %v214_v5 = vld [vmem:[%s198_s24 + $0x10] sm:$0xff] }
  0x10   : > { %v215_v6 = vld [vmem:[%s198_s24 + $0x18] sm:$0xff]  ;;  %v221_v7 = vunpack.c.0.s8 %v212_v3  ;;  %v222_v8 = vunpack.c.1.s8 %v212_v3  ;;  %v223_v9 = vunpack.c.2.s8 %v212_v3  ;;  %v224_v10 = vunpack.c.3.s8 %v212_v3  ;;  %v216_v11 = vld [vmem:[%s198_s24 + $0x20] sm:$0xff]  ;;  %v217_v16 = vld [vmem:[%s198_s24 + $0x28] sm:$0xff] }
  0x11   : > { %v225_v12 = vunpack.c.0.s8 %v213_v4  ;;  %v226_v13 = vunpack.c.1.s8 %v213_v4  ;;  %v227_v14 = vunpack.c.2.s8 %v213_v4  ;;  %v228_v15 = vunpack.c.3.s8 %v213_v4  ;;  %v218_v21 = vld [vmem:[%s198_s24 + $0x30] sm:$0xff]  ;;  %v219_v26 = vld [vmem:[%s198_s24 + $0x38] sm:$0xff]  ;;  %v220_v31 = vld [vmem:[%s198_s24 + $0x40] sm:$0xff] }
  0x12   : > { %372 = vperm.xlu0 %568, %v211_v2   ;;  %v229_v17 = vunpack.c.0.s8 %v214_v5  ;;  %v230_v18 = vunpack.c.1.s8 %v214_v5  ;;  %v231_v19 = vunpack.c.2.s8 %v214_v5  ;;  %v232_v20 = vunpack.c.3.s8 %v214_v5 }
  0x13   : > { %v233_v22 = vunpack.c.0.s8 %v215_v6  ;;  %v234_v23 = vunpack.c.1.s8 %v215_v6  ;;  %v235_v24 = vunpack.c.2.s8 %v215_v6  ;;  %v236_v25 = vunpack.c.3.s8 %v215_v6 }
  0x14   : > { %v237_v27 = vunpack.c.0.s8 %v216_v11  ;;  %v238_v28 = vunpack.c.1.s8 %v216_v11  ;;  %v239_v29 = vunpack.c.2.s8 %v216_v11  ;;  %v240_v30 = vunpack.c.3.s8 %v216_v11 }
  0x15   : > { %v241_v32 = vunpack.c.0.s8 %v217_v16  ;;  %v242_v33 = vunpack.c.1.s8 %v217_v16  ;;  %v243_v34 = vunpack.c.2.s8 %v217_v16  ;;  %v244_v35 = vunpack.c.3.s8 %v217_v16 }
  0x16   : > { %v245_v36 = vunpack.c.0.s8 %v218_v21  ;;  %v246_v37 = vunpack.c.1.s8 %v218_v21  ;;  %v247_v38 = vunpack.c.2.s8 %v218_v21  ;;  %v248_v39 = vunpack.c.3.s8 %v218_v21 }
  0x17   : > { %v249_v40 = vunpack.c.0.s8 %v219_v26  ;;  %v250_v41 = vunpack.c.1.s8 %v219_v26  ;;  %v251_v42 = vunpack.c.2.s8 %v219_v26  ;;  %v252_v43 = vunpack.c.3.s8 %v219_v26 }
  0x18   : > { %v253_v44 = vunpack.c.0.s8 %v220_v31  ;;  %v254_v45 = vunpack.c.1.s8 %v220_v31  ;;  %v255_v46 = vunpack.c.2.s8 %v220_v31  ;;  %v256_v47 = vunpack.c.3.s8 %v220_v31 }
  0x19   : > { %v644_v48 = vand.u32 255, %v221_v7  ;;  %v646_v49 = vand.u32 255, %v222_v8  ;;  %v648_v50 = vand.u32 255, %v223_v9  ;;  %v650_v51 = vand.u32 255, %v224_v10 }
  0x1a   : > { %v652_v52 = vand.u32 255, %v225_v12  ;;  %v654_v53 = vand.u32 255, %v226_v13  ;;  %v656_v54 = vand.u32 255, %v227_v14  ;;  %v658_v55 = vand.u32 255, %v228_v15 }
  0x1b   : > { %v660_v56 = vand.u32 255, %v229_v17  ;;  %v662_v57 = vand.u32 255, %v230_v18  ;;  %v664_v58 = vand.u32 255, %v231_v19  ;;  %v666_v59 = vand.u32 255, %v232_v20 }
  0x1c   : > { %v668_v60 = vand.u32 255, %v233_v22  ;;  %v670_v61 = vand.u32 255, %v234_v23  ;;  %v672_v62 = vand.u32 255, %v235_v24  ;;  %v674_v63 = vand.u32 255, %v236_v25 }
  0x1d   : > { %v676_v0 = vand.u32 255, %v237_v27  ;;  %v678_v1 = vand.u32 255, %v238_v28  ;;  %v680_v2 = vand.u32 255, %v239_v29  ;;  %v682_v3 = vand.u32 255, %v240_v30 }
  0x1e   : > { %v684_v4 = vand.u32 255, %v241_v32  ;;  %v686_v5 = vand.u32 255, %v242_v33  ;;  %v688_v6 = vand.u32 255, %v243_v34  ;;  %v690_v7 = vand.u32 255, %v244_v35 }
  0x1f   : > { %v692_v8 = vand.u32 255, %v245_v36  ;;  %v694_v9 = vand.u32 255, %v246_v37  ;;  %v696_v10 = vand.u32 255, %v247_v38  ;;  %v698_v11 = vand.u32 255, %v248_v39 }
  0x20   : > { %v700_v12 = vand.u32 255, %v249_v40  ;;  %v702_v13 = vand.u32 255, %v250_v41  ;;  %v704_v14 = vand.u32 255, %v251_v42  ;;  %v706_v15 = vand.u32 255, %v252_v43 }
  0x21   : > { %v708_v16 = vand.u32 255, %v253_v44  ;;  %v710_v17 = vand.u32 255, %v254_v45  ;;  %v712_v18 = vand.u32 255, %v255_v46  ;;  %v714_v19 = vand.u32 255, %v256_v47 }
  0x22   : > { %v293_v20 = vcvt.s32.f32 %v644_v48  ;;  %v294_v21 = vcvt.s32.f32 %v646_v49  ;;  %v295_v22 = vcvt.s32.f32 %v648_v50  ;;  %v296_v23 = vcvt.s32.f32 %v650_v51 }
  0x23   : > { %v297_v24 = vcvt.s32.f32 %v652_v52  ;;  %v298_v25 = vcvt.s32.f32 %v654_v53  ;;  %v299_v26 = vcvt.s32.f32 %v656_v54  ;;  %v300_v27 = vcvt.s32.f32 %v658_v55 }
  0x24   : > { %v301_v28 = vcvt.s32.f32 %v660_v56  ;;  %v302_v29 = vcvt.s32.f32 %v662_v57  ;;  %v303_v30 = vcvt.s32.f32 %v664_v58  ;;  %v304_v31 = vcvt.s32.f32 %v666_v59 }
  0x25   : > { %v305_v32 = vcvt.s32.f32 %v668_v60  ;;  %v306_v33 = vcvt.s32.f32 %v670_v61  ;;  %v307_v34 = vcvt.s32.f32 %v672_v62  ;;  %v308_v35 = vcvt.s32.f32 %v674_v63 }
  0x26   : > { %v309_v36 = vcvt.s32.f32 %v676_v0  ;;  %v310_v37 = vcvt.s32.f32 %v678_v1  ;;  %v311_v38 = vcvt.s32.f32 %v680_v2  ;;  %v312_v39 = vcvt.s32.f32 %v682_v3 }
  0x27   : > { %v313_v40 = vcvt.s32.f32 %v684_v4  ;;  %v314_v41 = vcvt.s32.f32 %v686_v5  ;;  %v315_v42 = vcvt.s32.f32 %v688_v6  ;;  %v316_v43 = vcvt.s32.f32 %v690_v7 }
  0x28   : > { %v317_v44 = vcvt.s32.f32 %v692_v8  ;;  %v318_v45 = vcvt.s32.f32 %v694_v9  ;;  %v319_v46 = vcvt.s32.f32 %v696_v10  ;;  %v320_v47 = vcvt.s32.f32 %v698_v11 }
  0x29   : > { %v321_v48 = vcvt.s32.f32 %v700_v12  ;;  %v322_v49 = vcvt.s32.f32 %v702_v13  ;;  %v323_v50 = vcvt.s32.f32 %v704_v14  ;;  %v324_v51 = vcvt.s32.f32 %v706_v15 }
  0x2a   : > { %v325_v53 = vcvt.s32.f32 %v708_v16  ;;  %v326_v54 = vcvt.s32.f32 %v710_v17  ;;  %v327_v55 = vcvt.s32.f32 %v712_v18  ;;  %v328_v56 = vcvt.s32.f32 %v714_v19 }
  0x89   : > { %v332_v52 = vpop.permute.xlu0 %331 }
  0x8a   : > { %v334_v57 = vmul.f32 %v332_v52, %v293_v20  ;;  %v335_v58 = vmul.f32 %v332_v52, %v294_v21  ;;  %v336_v59 = vmul.f32 %v332_v52, %v295_v22  ;;  %v337_v60 = vmul.f32 %v332_v52, %v296_v23 }
  0x8b   : > { %v338_v61 = vmul.f32 %v332_v52, %v297_v24  ;;  %v339_v62 = vmul.f32 %v332_v52, %v298_v25  ;;  %v340_v63 = vmul.f32 %v332_v52, %v299_v26  ;;  %v341_v0 = vmul.f32 %v332_v52, %v300_v27 }
  0x8c   : > { %v342_v1 = vmul.f32 %v332_v52, %v301_v28  ;;  %v343_v2 = vmul.f32 %v332_v52, %v302_v29  ;;  %v344_v3 = vmul.f32 %v332_v52, %v303_v30  ;;  %v345_v4 = vmul.f32 %v332_v52, %v304_v31 }
  0x8d   : > { %v346_v5 = vmul.f32 %v332_v52, %v305_v32  ;;  %v347_v6 = vmul.f32 %v332_v52, %v306_v33  ;;  %v348_v7 = vmul.f32 %v332_v52, %v307_v34  ;;  %v349_v8 = vmul.f32 %v332_v52, %v308_v35  ;;  %v753_v17 = vpop.permute.xlu0 %372 }
  0x8e   : > { %v350_v9 = vmul.f32 %v332_v52, %v309_v36  ;;  %v351_v10 = vmul.f32 %v332_v52, %v310_v37  ;;  %v352_v11 = vmul.f32 %v332_v52, %v311_v38  ;;  %v353_v12 = vmul.f32 %v332_v52, %v312_v39 }
  0x8f   : > { %v354_v13 = vmul.f32 %v332_v52, %v313_v40  ;;  %v355_v14 = vmul.f32 %v332_v52, %v314_v41  ;;  %v356_v15 = vmul.f32 %v332_v52, %v315_v42  ;;  %v357_v16 = vmul.f32 %v332_v52, %v316_v43 }
  0x90   : > { %v358_v18 = vmul.f32 %v332_v52, %v317_v44  ;;  %v359_v19 = vmul.f32 %v332_v52, %v318_v45  ;;  %v360_v20 = vmul.f32 %v332_v52, %v319_v46  ;;  %v361_v21 = vmul.f32 %v332_v52, %v320_v47 }
  0x91   : > { %v362_v22 = vmul.f32 %v332_v52, %v321_v48  ;;  %v363_v23 = vmul.f32 %v332_v52, %v322_v49  ;;  %v364_v24 = vmul.f32 %v332_v52, %v323_v50  ;;  %v365_v25 = vmul.f32 %v332_v52, %v324_v51 }
  0x92   : > { %v366_v26 = vmul.f32 %v332_v52, %v325_v53  ;;  %v367_v27 = vmul.f32 %v332_v52, %v326_v54  ;;  %v368_v28 = vmul.f32 %v332_v52, %v327_v55  ;;  %v369_v29 = vmul.f32 %v332_v52, %v328_v56 }
  0x93   : > { %v375_v30 = vadd.f32 %v753_v17, %v334_v57  ;;  %v376_v31 = vadd.f32 %v753_v17, %v335_v58  ;;  %v377_v32 = vadd.f32 %v753_v17, %v336_v59  ;;  %v378_v33 = vadd.f32 %v753_v17, %v337_v60 }
  0x94   : > { %v379_v34 = vadd.f32 %v753_v17, %v338_v61  ;;  %v380_v35 = vadd.f32 %v753_v17, %v339_v62  ;;  %v381_v36 = vadd.f32 %v753_v17, %v340_v63  ;;  %v382_v37 = vadd.f32 %v753_v17, %v341_v0 }
  0x95   : > { %v383_v38 = vadd.f32 %v753_v17, %v342_v1  ;;  %v384_v39 = vadd.f32 %v753_v17, %v343_v2  ;;  %v385_v40 = vadd.f32 %v753_v17, %v344_v3  ;;  %v386_v41 = vadd.f32 %v753_v17, %v345_v4  ;;  %411 = vst [vmem:[%s758_s28] sm:$0x3f] %v375_v30 }
  0x96   : > { %412 = vst [vmem:[%s758_s28 + $0x8] sm:$0x3f] %v376_v31  ;;  %413 = vst [vmem:[%s758_s28 + $0x10] sm:$0x3f] %v377_v32  ;;  %v387_v42 = vadd.f32 %v753_v17, %v346_v5  ;;  %v388_v43 = vadd.f32 %v753_v17, %v347_v6  ;;  %v389_v44 = vadd.f32 %v753_v17, %v348_v7 }
  0x97   : > { %414 = vst [vmem:[%s758_s28 + $0x18] sm:$0x3f] %v378_v33  ;;  %v390_v45 = vadd.f32 %v753_v17, %v349_v8  ;;  %415 = vst [vmem:[%s758_s28 + $0x20] sm:$0x3f] %v379_v34  ;;  %v391_v46 = vadd.f32 %v753_v17, %v350_v9  ;;  %v392_v47 = vadd.f32 %v753_v17, %v351_v10 }
  0x98   : > { %416 = vst [vmem:[%s758_s28 + $0x28] sm:$0x3f] %v380_v35  ;;  %417 = vst [vmem:[%s758_s28 + $0x30] sm:$0x3f] %v381_v36  ;;  %v393_v48 = vadd.f32 %v753_v17, %v352_v11  ;;  %v394_v49 = vadd.f32 %v753_v17, %v353_v12  ;;  %v395_v50 = vadd.f32 %v753_v17, %v354_v13 }
  0x99   : > { %418 = vst [vmem:[%s758_s28 + $0x38] sm:$0x3f] %v382_v37  ;;  %419 = vst [vmem:[%s758_s28 + $0x40] sm:$0x3f] %v383_v38  ;;  %v396_v51 = vadd.f32 %v753_v17, %v355_v14  ;;  %v397_v52 = vadd.f32 %v753_v17, %v356_v15  ;;  %v398_v53 = vadd.f32 %v753_v17, %v357_v16 }
  0x9a   : > { %420 = vst [vmem:[%s758_s28 + $0x48] sm:$0x3f] %v384_v39  ;;  %421 = vst [vmem:[%s758_s28 + $0x50] sm:$0x3f] %v385_v40  ;;  %v399_v54 = vadd.f32 %v753_v17, %v358_v18  ;;  %v400_v55 = vadd.f32 %v753_v17, %v359_v19  ;;  %v401_v56 = vadd.f32 %v753_v17, %v360_v20 }
  0x9b   : > { %422 = vst [vmem:[%s758_s28 + $0x58] sm:$0x3f] %v386_v41  ;;  %423 = vst [vmem:[%s758_s28 + $0x60] sm:$0x3f] %v387_v42  ;;  %v402_v57 = vadd.f32 %v753_v17, %v361_v21  ;;  %v403_v58 = vadd.f32 %v753_v17, %v362_v22  ;;  %v404_v59 = vadd.f32 %v753_v17, %v363_v23 }
  0x9c   : > { %424 = vst [vmem:[%s758_s28 + $0x68] sm:$0x3f] %v388_v43  ;;  %425 = vst [vmem:[%s758_s28 + $0x70] sm:$0x3f] %v389_v44  ;;  %v405_v60 = vadd.f32 %v753_v17, %v364_v24  ;;  %v406_v61 = vadd.f32 %v753_v17, %v365_v25  ;;  %v407_v62 = vadd.f32 %v753_v17, %v366_v26 }
  0x9d   : > { %426 = vst [vmem:[%s758_s28 + $0x78] sm:$0x3f] %v390_v45  ;;  %427 = vst [vmem:[%s758_s28 + $0x80] sm:$0x3f] %v391_v46  ;;  %v408_v63 = vadd.f32 %v753_v17, %v367_v27  ;;  %v409_v0 = vadd.f32 %v753_v17, %v368_v28  ;;  %v410_v1 = vadd.f32 %v753_v17, %v369_v29 }
  0x9e   : > { %428 = vst [vmem:[%s758_s28 + $0x88] sm:$0x3f] %v392_v47  ;;  %429 = vst [vmem:[%s758_s28 + $0x90] sm:$0x3f] %v393_v48 }
  0x9f   : > { %430 = vst [vmem:[%s758_s28 + $0x98] sm:$0x3f] %v394_v49  ;;  %431 = vst [vmem:[%s758_s28 + $0xa0] sm:$0x3f] %v395_v50 }
  0xa0   : > { %432 = vst [vmem:[%s758_s28 + $0xa8] sm:$0x3f] %v396_v51  ;;  %433 = vst [vmem:[%s758_s28 + $0xb0] sm:$0x3f] %v397_v52 }
  0xa1   : > { %434 = vst [vmem:[%s758_s28 + $0xb8] sm:$0x3f] %v398_v53  ;;  %435 = vst [vmem:[%s758_s28 + $0xc0] sm:$0x3f] %v399_v54 }
  0xa2   : > { %436 = vst [vmem:[%s758_s28 + $0xc8] sm:$0x3f] %v400_v55  ;;  %437 = vst [vmem:[%s758_s28 + $0xd0] sm:$0x3f] %v401_v56 }
  0xa3   : > { %438 = vst [vmem:[%s758_s28 + $0xd8] sm:$0x3f] %v402_v57  ;;  %439 = vst [vmem:[%s758_s28 + $0xe0] sm:$0x3f] %v403_v58 }
  0xa4   : > { %440 = vst [vmem:[%s758_s28 + $0xe8] sm:$0x3f] %v404_v59  ;;  %441 = vst [vmem:[%s758_s28 + $0xf0] sm:$0x3f] %v405_v60 }
  0xa5   : > { %442 = vst [vmem:[%s758_s28 + $0xf8] sm:$0x3f] %v406_v61  ;;  %443 = vst [vmem:[%s758_s28 + $0x100] sm:$0x3f] %v407_v62 }
  0xa6   : > { %444 = vst [vmem:[%s758_s28 + $0x108] sm:$0x3f] %v408_v63  ;;  %445 = vst [vmem:[%s758_s28 + $0x110] sm:$0x3f] %v409_v0 }
  0xa7   : > { %446 = vst [vmem:[%s758_s28 + $0x118] sm:$0x3f] %v410_v1 }
  0xa8 PF: > { %s13_s14 = sadd.s32 1, %s591_s14   ;;  %s845_s12 = smov %s587_s13 }
  0xa9   : > { %p10_p5 = scmp.ge.s32.totalorder %s13_s14, 4   ;;  %s846_s13 = smov %s848_s15 }
  0xab   :  { %12 = sbr.rel (!%p10_p5) target bundleno = 2 (0x2), region = 62 }

</bundles_post_ra>
